<compile_context>
chip_gen: v7x
topology: tpu7x:2x2x1
jax: 0.10.0
libtpu: 0.0.40
codegen_flags: <defaults>
</compile_context>

<pallas_src>
import numpy as np
import jax
import jax.numpy as jnp
from jax.experimental import pallas as pl
from jax.experimental.pallas import tpu as pltpu


def _round_up(x, n):
    return ((x + n - 1) // n) * n


def _num_tensorcores():
    """Best-effort detection: v7x has 2 TensorCores per chip, v5e/v6e have 1."""
    try:
        kind = jax.devices()[0].device_kind.lower()
        if "v7" in kind:
            return 2
    except Exception:
        pass
    return 1


def _make_mlp_kernel(apply_tanh, out_pad, compute_dtype):
    """Whole drrnn stack on one batch tile.

    Activations are (features, batch): every bias add / tanh / store is
    lane-dense.  Layer 0 uses a separate small weight (m_pad, in_pad) so the
    x tile only carries in_pad feature rows.
    """
    n_layers = len(apply_tanh)

    def kernel(x_ref, w0_ref, w_ref, b_ref, o_ref):
        # Layer 0: (m_pad, in_pad) @ (in_pad, T) -> (m_pad, T), f32 accumulate.
        h = jnp.dot(w0_ref[...], x_ref[...].astype(compute_dtype),
                    preferred_element_type=jnp.float32) + b_ref[0]
        if apply_tanh[0]:
            h = jnp.tanh(h)
        # Remaining layers: static unroll over the packed (m_pad, m_pad) weights.
        for i in range(1, n_layers):
            w = w_ref[i - 1]                       # (m_pad, m_pad) compute_dtype
            b = b_ref[i]                           # (m_pad, 1) f32
            h = jnp.dot(w, h.astype(compute_dtype),
                        preferred_element_type=jnp.float32) + b
            if apply_tanh[i]:
                h = jnp.tanh(h)                    # EUP, all 128 lanes live
        # Unmasked lane-dense (out_pad, T) store (out_pad is a multiple of 8).
        o_ref[...] = h[:out_pad, :].astype(o_ref.dtype)

    return kernel


def drrnn_forward(x, params, apply_tanh, *, batch_tile=None,
                  compute_dtype=jnp.bfloat16):
    """Pallas forward pass of drrnn.

    x:      (N, in_N) float32 (PyTorch batch-major layout)
    params: list of (W, b), W (fan_out, fan_in) [PyTorch nn.Linear layout],
            b (fan_out,).  Must be concrete arrays (packed host-side once per
            call; hoist/cache the packing for repeated calls under jit).
    """
    N, in_N = x.shape
    out_N = params[-1][0].shape[0]
    n_layers = len(params)
    assert n_layers == len(apply_tanh) and n_layers >= 2

    # Padded sizes: features to the sublane minimum / common hidden width.
    in_pad = _round_up(in_N, 8)
    out_pad = _round_up(out_N, 8)
    m_pad = _round_up(max([in_N, out_N] + [w.shape[0] for w, _ in params]), 8)

    # Batch tiling: lane-dense (multiple of 128).  Single-TC chips: as few
    # grid steps as possible (each step costs ~0.35us >> per-step compute
    # here).  Dual-TC (v7x): >=2 steps per core so pipelining hides DMAs.
    if batch_tile is None:
        ncores = _num_tensorcores()
        n128 = max(1, pl.cdiv(N, 128))
        target_steps = 2 * ncores if ncores >= 2 else 1
        batch_tile = 128 * max(1, pl.cdiv(n128, target_steps))
        batch_tile = min(batch_tile, 2048)
    batch_tile = _round_up(batch_tile, 128)
    n_pad = _round_up(max(N, batch_tile), batch_tile)
    grid = (n_pad // batch_tile,)

    # --- Host-side packing (numpy: no traced dynamic-update-slice chain) ----
    w0_np = np.zeros((m_pad, in_pad), np.float32)
    fo0, fi0 = params[0][0].shape
    w0_np[:fo0, :fi0] = np.asarray(params[0][0], np.float32)

    w_pack_np = np.zeros((max(n_layers - 1, 1), m_pad, m_pad), np.float32)
    b_pack_np = np.zeros((n_layers, m_pad, 1), np.float32)
    b_pack_np[0, :fo0, 0] = np.asarray(params[0][1], np.float32)
    for i in range(1, n_layers):
        w, b = params[i]
        fo, fi = w.shape
        w_pack_np[i - 1, :fo, :fi] = np.asarray(w, np.float32)
        b_pack_np[i, :fo, 0] = np.asarray(b, np.float32)

    w0 = jnp.asarray(w0_np, compute_dtype)        # bf16 halves weight DMA/VMEM
    w_pack = jnp.asarray(w_pack_np, compute_dtype)
    b_pack = jnp.asarray(b_pack_np, jnp.float32)  # bias add stays f32

    # Relayout: batch on lanes; pad features only to in_pad, batch to n_pad.
    x_t = jnp.pad(x.T.astype(jnp.float32), ((0, in_pad - in_N), (0, n_pad - N)))

    kernel = _make_mlp_kernel(tuple(apply_tanh), out_pad, compute_dtype)

    x_spec = pl.BlockSpec((in_pad, batch_tile), lambda i: (0, i))
    w0_spec = pl.BlockSpec((m_pad, in_pad), lambda i: (0, 0))
    w_spec = pl.BlockSpec((max(n_layers - 1, 1), m_pad, m_pad),
                          lambda i: (0, 0, 0))
    b_spec = pl.BlockSpec((n_layers, m_pad, 1), lambda i: (0, 0, 0))
    o_spec = pl.BlockSpec((out_pad, batch_tile), lambda i: (0, i))

    # Explicit VMEM budget from the actual buffers (x2 for double-buffering),
    # plus headroom for the (m_pad, batch_tile) f32 activation intermediates.
    c_item = jnp.dtype(compute_dtype).itemsize
    w_bytes = (w0_np.size + w_pack_np.size) * c_item + b_pack_np.size * 4
    io_bytes = (in_pad + out_pad) * batch_tile * 4
    h_bytes = m_pad * batch_tile * 4
    vmem_limit = int(2 * (w_bytes + io_bytes) + 4 * h_bytes + (8 << 20))
    vmem_limit = max(16 << 20, min(vmem_limit, 60 << 20))

    y_t = pl.pallas_call(
        kernel,
        out_shape=jax.ShapeDtypeStruct((out_pad, n_pad), jnp.float32),
        grid_spec=pltpu.PrefetchScalarGridSpec(
            num_scalar_prefetch=0,
            grid=grid,
            in_specs=[x_spec, w0_spec, w_spec, b_spec],
            out_specs=o_spec,
        ),
        compiler_params=pltpu.CompilerParams(
            dimension_semantics=("parallel",),
            vmem_limit_bytes=vmem_limit),
    )(x_t, w0, w_pack, b_pack)

    return y_t[:out_N, :N].T                      # back to (N, out_N)


def init_drrnn_params(key, in_N, m, out_N, depth):
    """PyTorch-style init U(-1/sqrt(fan_in), 1/sqrt(fan_in)); W is (out, in).

    Layer order matches drrnn.forward:
      Linear(in_N,m), [Block: Linear(m,m)+tanh, Linear(m,m)+tanh] * depth,
      Linear(m,out_N)
    """
    dims = [(m, in_N)]
    tanh_flags = [False]
    for _ in range(depth):
        dims += [(m, m), (m, m)]
        tanh_flags += [True, True]
    dims.append((out_N, m))
    tanh_flags.append(False)

    params = []
    for (fo, fi) in dims:
        key, kw, kb = jax.random.split(key, 3)
        bound = 1.0 / (fi ** 0.5)
        w = jax.random.uniform(kw, (fo, fi), jnp.float32, -bound, bound)
        b = jax.random.uniform(kb, (fo,), jnp.float32, -bound, bound)
        params.append((w, b))
    return params, tanh_flags


def drrnn_reference(x, params, apply_tanh):
    h = x
    for (w, b), act in zip(params, apply_tanh):
        h = jnp.dot(h, w.T, precision=jax.lax.Precision.HIGHEST) + b
        if act:
            h = jnp.tanh(h)
    return h


if __name__ == "__main__":
    # Small, drrnn-consistent shapes: 2-D PDE input -> scalar output.
    in_N, m, out_N, depth = 2, 32, 1, 2
    N = 512  # batch of collocation points

    key = jax.random.PRNGKey(0)
    key, kx = jax.random.split(key)
    x = jax.random.normal(kx, (N, in_N), jnp.float32)

    params, tanh_flags = init_drrnn_params(key, in_N, m, out_N, depth)
    y_ref = drrnn_reference(x, params, tanh_flags)

    # Default bf16-matmul path (MXU-native); bias add / tanh stay f32.
    y_bf16 = drrnn_forward(x, params, tanh_flags)
    y_bf16 = jax.block_until_ready(y_bf16)
    assert y_bf16.shape == (N, out_N)
    assert jnp.allclose(y_bf16, y_ref, atol=5e-2, rtol=5e-2), "bf16 mismatch vs reference"

    # f32 path: tight check against the reference.
    y_f32 = drrnn_forward(x, params, tanh_flags, compute_dtype=jnp.float32)
    y_f32 = jax.block_until_ready(y_f32)
    assert jnp.allclose(y_f32, y_ref, atol=1e-3, rtol=1e-3), "f32 mismatch vs reference"

    print("KERNEL_OK")
</pallas_src>

<mosaic_0001>
module attributes {stable_mosaic.version = 11 : i64} {
  func.func @kernel(%arg0: i32, %arg1: memref<8x512xf32, #tpu.memory_space<vmem>>, %arg2: memref<32x8xbf16, #tpu.memory_space<vmem>>, %arg3: memref<5x32x32xbf16, #tpu.memory_space<vmem>>, %arg4: memref<6x32x1xf32, #tpu.memory_space<vmem>>, %arg5: memref<8x512xf32, #tpu.memory_space<vmem>>) attributes {dimension_semantics = [#tpu.dimension_semantics<parallel>], iteration_bounds = array<i64: 1>, scalar_prefetch = 0 : i64, scratch_operands = 0 : i64, tpu.core_type = #tpu.core_type<tc>, window_params = [{transform_indices = @transform_0, window_bounds = array<i64: 8, 512>}, {pipeline_mode = #tpu.pipeline_mode<synchronous>, transform_indices = @transform_1, window_bounds = array<i64: 32, 8>}, {pipeline_mode = #tpu.pipeline_mode<synchronous>, transform_indices = @transform_2, window_bounds = array<i64: 5, 32, 32>}, {pipeline_mode = #tpu.pipeline_mode<synchronous>, transform_indices = @transform_3, window_bounds = array<i64: 6, 32, 1>}, {transform_indices = @transform_4, window_bounds = array<i64: 8, 512>}]} {
    %c0 = arith.constant 0 : index
    %c0_0 = arith.constant 0 : index
    %0 = vector.load %arg2[%c0, %c0_0] : memref<32x8xbf16, #tpu.memory_space<vmem>>, vector<32x8xbf16>
    %c0_1 = arith.constant 0 : index
    %c0_2 = arith.constant 0 : index
    %1 = vector.load %arg1[%c0_1, %c0_2] : memref<8x512xf32, #tpu.memory_space<vmem>>, vector<8x512xf32>
    %2 = arith.truncf %1 : vector<8x512xf32> to vector<8x512xbf16>
    %cst = arith.constant dense<0.000000e+00> : vector<32x512xf32>
    %3 = tpu.matmul %0, %2, %cst {dimension_numbers = #tpu.dot_dimension_numbers<[1], [0], [0], [1], [0, 0, 1, 1], [], []>} : vector<32x8xbf16>, vector<8x512xbf16>, vector<32x512xf32> -> vector<32x512xf32>
    %c0_3 = arith.constant 0 : index
    %c0_4 = arith.constant 0 : index
    %c0_5 = arith.constant 0 : index
    %4 = vector.load %arg4[%c0_3, %c0_4, %c0_5] : memref<6x32x1xf32, #tpu.memory_space<vmem>>, vector<1x32x1xf32>
    %5 = vector.shape_cast %4 : vector<1x32x1xf32> to vector<32x1xf32>
    %6 = vector.broadcast %5 : vector<32x1xf32> to vector<32x512xf32>
    %7 = arith.addf %3, %6 : vector<32x512xf32>
    %c0_6 = arith.constant 0 : index
    %c0_7 = arith.constant 0 : index
    %c0_8 = arith.constant 0 : index
    %8 = vector.load %arg3[%c0_6, %c0_7, %c0_8] : memref<5x32x32xbf16, #tpu.memory_space<vmem>>, vector<1x32x32xbf16>
    %9 = vector.shape_cast %8 : vector<1x32x32xbf16> to vector<32x32xbf16>
    %c1 = arith.constant 1 : index
    %c0_9 = arith.constant 0 : index
    %c0_10 = arith.constant 0 : index
    %10 = vector.load %arg4[%c1, %c0_9, %c0_10] : memref<6x32x1xf32, #tpu.memory_space<vmem>>, vector<1x32x1xf32>
    %11 = vector.shape_cast %10 : vector<1x32x1xf32> to vector<32x1xf32>
    %12 = arith.truncf %7 : vector<32x512xf32> to vector<32x512xbf16>
    %cst_11 = arith.constant dense<0.000000e+00> : vector<32x512xf32>
    %13 = tpu.matmul %9, %12, %cst_11 {dimension_numbers = #tpu.dot_dimension_numbers<[1], [0], [0], [1], [0, 0, 1, 1], [], []>} : vector<32x32xbf16>, vector<32x512xbf16>, vector<32x512xf32> -> vector<32x512xf32>
    %14 = vector.broadcast %11 : vector<32x1xf32> to vector<32x512xf32>
    %15 = arith.addf %13, %14 : vector<32x512xf32>
    %16 = math.tanh %15 : vector<32x512xf32>
    %c1_12 = arith.constant 1 : index
    %c0_13 = arith.constant 0 : index
    %c0_14 = arith.constant 0 : index
    %17 = vector.load %arg3[%c1_12, %c0_13, %c0_14] : memref<5x32x32xbf16, #tpu.memory_space<vmem>>, vector<1x32x32xbf16>
    %18 = vector.shape_cast %17 : vector<1x32x32xbf16> to vector<32x32xbf16>
    %c2 = arith.constant 2 : index
    %c0_15 = arith.constant 0 : index
    %c0_16 = arith.constant 0 : index
    %19 = vector.load %arg4[%c2, %c0_15, %c0_16] : memref<6x32x1xf32, #tpu.memory_space<vmem>>, vector<1x32x1xf32>
    %20 = vector.shape_cast %19 : vector<1x32x1xf32> to vector<32x1xf32>
    %21 = arith.truncf %16 : vector<32x512xf32> to vector<32x512xbf16>
    %cst_17 = arith.constant dense<0.000000e+00> : vector<32x512xf32>
    %22 = tpu.matmul %18, %21, %cst_17 {dimension_numbers = #tpu.dot_dimension_numbers<[1], [0], [0], [1], [0, 0, 1, 1], [], []>} : vector<32x32xbf16>, vector<32x512xbf16>, vector<32x512xf32> -> vector<32x512xf32>
    %23 = vector.broadcast %20 : vector<32x1xf32> to vector<32x512xf32>
    %24 = arith.addf %22, %23 : vector<32x512xf32>
    %25 = math.tanh %24 : vector<32x512xf32>
    %c2_18 = arith.constant 2 : index
    %c0_19 = arith.constant 0 : index
    %c0_20 = arith.constant 0 : index
    %26 = vector.load %arg3[%c2_18, %c0_19, %c0_20] : memref<5x32x32xbf16, #tpu.memory_space<vmem>>, vector<1x32x32xbf16>
    %27 = vector.shape_cast %26 : vector<1x32x32xbf16> to vector<32x32xbf16>
    %c3 = arith.constant 3 : index
    %c0_21 = arith.constant 0 : index
    %c0_22 = arith.constant 0 : index
    %28 = vector.load %arg4[%c3, %c0_21, %c0_22] : memref<6x32x1xf32, #tpu.memory_space<vmem>>, vector<1x32x1xf32>
    %29 = vector.shape_cast %28 : vector<1x32x1xf32> to vector<32x1xf32>
    %30 = arith.truncf %25 : vector<32x512xf32> to vector<32x512xbf16>
    %cst_23 = arith.constant dense<0.000000e+00> : vector<32x512xf32>
    %31 = tpu.matmul %27, %30, %cst_23 {dimension_numbers = #tpu.dot_dimension_numbers<[1], [0], [0], [1], [0, 0, 1, 1], [], []>} : vector<32x32xbf16>, vector<32x512xbf16>, vector<32x512xf32> -> vector<32x512xf32>
    %32 = vector.broadcast %29 : vector<32x1xf32> to vector<32x512xf32>
    %33 = arith.addf %31, %32 : vector<32x512xf32>
    %34 = math.tanh %33 : vector<32x512xf32>
    %c3_24 = arith.constant 3 : index
    %c0_25 = arith.constant 0 : index
    %c0_26 = arith.constant 0 : index
    %35 = vector.load %arg3[%c3_24, %c0_25, %c0_26] : memref<5x32x32xbf16, #tpu.memory_space<vmem>>, vector<1x32x32xbf16>
    %36 = vector.shape_cast %35 : vector<1x32x32xbf16> to vector<32x32xbf16>
    %c4 = arith.constant 4 : index
    %c0_27 = arith.constant 0 : index
    %c0_28 = arith.constant 0 : index
    %37 = vector.load %arg4[%c4, %c0_27, %c0_28] : memref<6x32x1xf32, #tpu.memory_space<vmem>>, vector<1x32x1xf32>
    %38 = vector.shape_cast %37 : vector<1x32x1xf32> to vector<32x1xf32>
    %39 = arith.truncf %34 : vector<32x512xf32> to vector<32x512xbf16>
    %cst_29 = arith.constant dense<0.000000e+00> : vector<32x512xf32>
    %40 = tpu.matmul %36, %39, %cst_29 {dimension_numbers = #tpu.dot_dimension_numbers<[1], [0], [0], [1], [0, 0, 1, 1], [], []>} : vector<32x32xbf16>, vector<32x512xbf16>, vector<32x512xf32> -> vector<32x512xf32>
    %41 = vector.broadcast %38 : vector<32x1xf32> to vector<32x512xf32>
    %42 = arith.addf %40, %41 : vector<32x512xf32>
    %43 = math.tanh %42 : vector<32x512xf32>
    %c4_30 = arith.constant 4 : index
    %c0_31 = arith.constant 0 : index
    %c0_32 = arith.constant 0 : index
    %44 = vector.load %arg3[%c4_30, %c0_31, %c0_32] : memref<5x32x32xbf16, #tpu.memory_space<vmem>>, vector<1x32x32xbf16>
    %45 = vector.shape_cast %44 : vector<1x32x32xbf16> to vector<32x32xbf16>
    %c5 = arith.constant 5 : index
    %c0_33 = arith.constant 0 : index
    %c0_34 = arith.constant 0 : index
    %46 = vector.load %arg4[%c5, %c0_33, %c0_34] : memref<6x32x1xf32, #tpu.memory_space<vmem>>, vector<1x32x1xf32>
    %47 = vector.shape_cast %46 : vector<1x32x1xf32> to vector<32x1xf32>
    %48 = arith.truncf %43 : vector<32x512xf32> to vector<32x512xbf16>
    %cst_35 = arith.constant dense<0.000000e+00> : vector<32x512xf32>
    %49 = tpu.matmul %45, %48, %cst_35 {dimension_numbers = #tpu.dot_dimension_numbers<[1], [0], [0], [1], [0, 0, 1, 1], [], []>} : vector<32x32xbf16>, vector<32x512xbf16>, vector<32x512xf32> -> vector<32x512xf32>
    %50 = vector.broadcast %47 : vector<32x1xf32> to vector<32x512xf32>
    %51 = arith.addf %49, %50 : vector<32x512xf32>
    %52 = vector.extract_strided_slice %51 {offsets = [0, 0], sizes = [8, 512], strides = [1, 1]} : vector<32x512xf32> to vector<8x512xf32>
    %c0_36 = arith.constant 0 : index
    %c0_37 = arith.constant 0 : index
    %53 = vector.load %arg5[%c0_36, %c0_37] : memref<8x512xf32, #tpu.memory_space<vmem>>, vector<8x512xf32>
    tpu.vector_store %arg5[%c0_36, %c0_37], %52 {strides = array<i32>} : memref<8x512xf32, #tpu.memory_space<vmem>>, vector<8x512xf32>,
    return
  }
  func.func @transform_0(%arg0: i32) -> (i32, i32) {
    %c0_i32 = arith.constant 0 : i32
    %c0_i32_0 = arith.constant 0 : i32
    return %c0_i32, %arg0 : i32, i32
  }
  func.func @transform_1(%arg0: i32) -> (i32, i32) {
    %c0_i32 = arith.constant 0 : i32
    %c0_i32_0 = arith.constant 0 : i32
    %c0_i32_1 = arith.constant 0 : i32
    return %c0_i32, %c0_i32_0 : i32, i32
  }
  func.func @transform_2(%arg0: i32) -> (i32, i32, i32) {
    %c0_i32 = arith.constant 0 : i32
    %c0_i32_0 = arith.constant 0 : i32
    %c0_i32_1 = arith.constant 0 : i32
    %c0_i32_2 = arith.constant 0 : i32
    return %c0_i32, %c0_i32_0, %c0_i32_1 : i32, i32, i32
  }
  func.func @transform_3(%arg0: i32) -> (i32, i32, i32) {
    %c0_i32 = arith.constant 0 : i32
    %c0_i32_0 = arith.constant 0 : i32
    %c0_i32_1 = arith.constant 0 : i32
    %c0_i32_2 = arith.constant 0 : i32
    return %c0_i32, %c0_i32_0, %c0_i32_1 : i32, i32, i32
  }
  func.func @transform_4(%arg0: i32) -> (i32, i32) {
    %c0_i32 = arith.constant 0 : i32
    %c0_i32_0 = arith.constant 0 : i32
    return %c0_i32, %arg0 : i32, i32
  }
}

</mosaic_0001>

<bundles_post_ra>
// kernel: tpu_custom_call.1
= control target key start
LH: loop header
LB: loop body
LE: loop exit
PB: predicated region body
PF: predicated region fallthrough
CT: control target
= control target key end

     0   :  { %vm72_vm0 = vcmask 1043456   ;;  %v1300_v7 = vmov 0   ;;  %vm65_vm1 = vcmask 64512   ;;  %s1504_s0 = inlined_call_operand.vmem [shape: f32[8,512], index: 0, kind: input, shape index: {}]   ;;  %s1505_s1 = inlined_call_operand.vmem [shape: bf16[32,8], index: 1, kind: input, shape index: {}]   ;;  %s1506_s2 = inlined_call_operand.vmem [shape: bf16[5,32,32], index: 2, kind: input, shape index: {}]   ;;  %s1507_s3 = inlined_call_operand.vmem [shape: f32[6,32,1], index: 3, kind: input, shape index: {}]   ;;  %s1508_s4 = inlined_call_operand.hbm [shape: f32[8,512], index: 4, kind: output, shape index: {}]  }
   0x1   :  { %v24_v0 = vld [vmem:[%s1504_s0 + $0x8] sm:$0xff]  ;;  %v26_v1 = vld [vmem:[%s1504_s0 + $0x18] sm:$0xff]  ;;  %v23_v2 = vld [vmem:[%s1504_s0] sm:$0xff]  ;;  %117 = vmatprep.mubr.bf16.mxu0 %v1300_v7  ;;  %170 = vmatprep.mubr.bf16.mxu1 %v1300_v7 }
   0x2   :  { %v28_v3 = vpack.c.bf16 %v24_v0, %v24_v0  ;;  %v30_v4 = vpack.c.bf16 %v26_v1, %v26_v1  ;;  %v27_v5 = vpack.c.bf16 %v23_v2, %v23_v2  ;;  %v25_v6 = vld [vmem:[%s1504_s0 + $0x10] sm:$0xff]  ;;  %1134 = vset.pattern.permute.xlu0 %v1300_v7  ;;  %1135 = vset.pattern.permute.xlu1 %v1300_v7  ;;  %v1136_v10 = vld [vmem:[%s1505_s1] sm:$0xff]   ;;  %v32_v14 = vld [vmem:[%s1507_s3 + $0x8] sm:$0xff] }
   0x3   :  { %v29_v8 = vpack.c.bf16 %v25_v6, %v25_v6  ;;  %v31_v11 = vld [vmem:[%s1507_s3] sm:$0xff]  ;;  %v33_v13 = vld [vmem:[%s1507_s3 + $0x10] sm:$0xff]  ;;  %v34_v15 = vld [vmem:[%s1507_s3 + $0x18] sm:$0xff] }
   0x4   :  { %1060 = vmatprep.subr.msk.bf16.mxu0 %vm72_vm0, %v28_v3  ;;  %1063 = vmatprep.subr.msk.bf16.mxu1 %vm72_vm0, %v30_v4  ;;  %v74_v9 = vsel %vm72_vm0, %v27_v5, 0  ;;  %v1137_v16 = vld [vmem:[%s1505_s1 + $0x8] sm:$0xff]   ;;  %v1066_v17 = vld [vmem:[%s1507_s3 + $0x20] sm:$0xff]  ;;  %v1068_v19 = vld [vmem:[%s1507_s3 + $0x30] sm:$0xff] }
   0x5   :  { %86 = vmatpush1.bf16.msra.mxu0 %v74_v9  ;;  %v80_v12 = vsel %vm72_vm0, %v29_v8, 0  ;;  %37 = vperm.xlu0 %1134, %v31_v11   ;;  %v1067_v18 = vld [vmem:[%s1507_s3 + $0x28] sm:$0xff]  ;;  %v1069_v20 = vld [vmem:[%s1507_s3 + $0x38] sm:$0xff] }
   0x6   :  { %139 = vmatpush1.bf16.msra.mxu1 %v80_v12  ;;  %47 = vperm.xlu1 %1135, %v33_v13  }
   0x8   :  { %1061 = vmatmul.mubr.msk.bf16.vlgmr.msra.gmra.mrb[0].mxu0 %vm65_vm1, %v1136_v10 }
   0x9   :  { %1064 = vmatmul.mubr.msk.bf16.vlgmr.msra.gmra.mrb[0].mxu1 %vm65_vm1, %v1136_v10  ;;  %127 = vmatprep.mubr.bf16.mxu0 %v1300_v7 }
   0xa   :  { %180 = vmatprep.mubr.bf16.mxu1 %v1300_v7  ;;  %42 = vperm.xlu0 %1134, %v32_v14  }
   0xb   :  { %52 = vperm.xlu1 %1135, %v34_v15  }
   0xe   :  { %210 = vperm.xlu0 %1134, %v1066_v17  }
   0xf   :  { %215 = vperm.xlu1 %1135, %v1067_v18  }
  0x10   :  { %1062 = vmatmul.mubr.msk.bf16.gmra.mrb[4].mxu0 %vm65_vm1, %v1137_v16 }
  0x11   :  { %1065 = vmatmul.mubr.msk.bf16.gmra.mrb[4].mxu1 %vm65_vm1, %v1137_v16  ;;  %277 = vmatprep.mubr.bf16.mxu0 %v1300_v7 }
  0x12   :  { %220 = vperm.xlu0 %1134, %v1068_v19   ;;  %330 = vmatprep.mubr.bf16.mxu1 %v1300_v7 }
  0x13   :  { %9 = vsyncpa [#allocation3], 0  ;;  %v1080_v21 = vld [vmem:[%s1507_s3 + $0x40] sm:$0xff]  ;;  %225 = vperm.xlu1 %1135, %v1069_v20   ;;  %v1081_v22 = vld [vmem:[%s1507_s3 + $0x48] sm:$0xff]  ;;  %vm238_vm2 = vcmask 261120   ;;  %s1301_s5 = smov [#allocation2]  }
  0x14   :  { %v1082_v23 = vld [vmem:[%s1507_s3 + $0x50] sm:$0xff]  ;;  %v1083_v24 = vld [vmem:[%s1507_s3 + $0x58] sm:$0xff]  ;;  %v1094_v25 = vld [vmem:[%s1507_s3 + $0x60] sm:$0xff]  ;;  %s1050_s6 = sshll.u32 %s1301_s5, 4  ;;  %s1051_s6 = int_to_ptr.vmem [resolvable:$true] %s1050_s6 }
  0x15   :  { %v1095_v26 = vld [vmem:[%s1507_s3 + $0x68] sm:$0xff]  ;;  %v1096_v27 = vld [vmem:[%s1507_s3 + $0x70] sm:$0xff]  ;;  %v1097_v28 = vld [vmem:[%s1507_s3 + $0x78] sm:$0xff]  ;;  %p1281_p1 = scmp.lt.s32.totalorder %s1051_s6, %s1051_s6 }
  0x16   :  { %387 = vperm.xlu0 %1134, %v1080_v21   ;;  %v1108_v29 = vld [vmem:[%s1507_s3 + $0x80] sm:$0xff]  ;;  %v1109_v30 = vld [vmem:[%s1507_s3 + $0x88] sm:$0xff]  ;;  %v1110_v31 = vld [vmem:[%s1507_s3 + $0x90] sm:$0xff] }
  0x17   :  { %392 = vperm.xlu1 %1135, %v1081_v22   ;;  %v1111_v32 = vld [vmem:[%s1507_s3 + $0x98] sm:$0xff]  ;;  %v1122_v33 = vld [vmem:[%s1507_s3 + $0xa0] sm:$0xff]  ;;  %v1139_v16 = vld [vmem:[%s1506_s2 + $0x8] sm:$0xff]  }
  0x18   :  { %v1138_v15 = vld [vmem:[%s1506_s2] sm:$0xff]  }
  0x1a   :  { %397 = vperm.xlu0 %1134, %v1082_v23  }
  0x1b   :  { %402 = vperm.xlu1 %1135, %v1083_v24  }
  0x1e   :  { %563 = vperm.xlu0 %1134, %v1094_v25  }
  0x1f   :  { %568 = vperm.xlu1 %1135, %v1095_v26  }
  0x22   :  { %573 = vperm.xlu0 %1134, %v1096_v27  }
  0x23   :  { %578 = vperm.xlu1 %1135, %v1097_v28  }
  0x26   :  { %739 = vperm.xlu0 %1134, %v1108_v29  }
  0x27   :  { %744 = vperm.xlu1 %1135, %v1109_v30  }
  0x2a   :  { %749 = vperm.xlu0 %1134, %v1110_v31  }
  0x2b   :  { %754 = vperm.xlu1 %1135, %v1111_v32  }
  0x2e   :  { %915 = vperm.xlu0 %1134, %v1122_v33  }
  0x84   :  { %v38_v34 = vpop.permute.xlu0 %37 }
  0x85   :  { %v48_v35 = vpop.permute.xlu1 %47 }
  0x89   :  { %v43_v36 = vpop.permute.xlu0 %42 }
  0x8a   :  { %v53_v57 = vpop.permute.xlu1 %52 }
  0x8d   :  { %v211_v17 = vpop.permute.xlu0 %210 }
  0x8e   :  { %v216_v18 = vpop.permute.xlu1 %215 }
  0xdb   :  { %v119_v37 = vpop.f32.mrb[0].mxu0 }
  0xdc   :  { %v172_v38 = vpop.f32.mrb[0].mxu1  ;;  %v121_v39 = vpop.f32.mrb[1].mxu0  ;;  %v120_v42 = vadd.f32 %v119_v37, %v38_v34 }
  0xdd   :  { %v174_v40 = vpop.f32.mrb[1].mxu1  ;;  %v123_v41 = vpop.f32.mrb[2].mxu0  ;;  %v173_v46 = vadd.f32 %v172_v38, %v38_v34  ;;  %v122_v47 = vadd.f32 %v121_v39, %v38_v34 }
  0xde   :  { %v124_v43 = vadd.f32 %v123_v41, %v43_v36  ;;  %v176_v44 = vpop.f32.mrb[2].mxu1  ;;  %v125_v45 = vpop.f32.mrb[3].mxu0  ;;  %v175_v51 = vadd.f32 %v174_v40, %v38_v34 }
  0xdf   :  { %v177_v48 = vadd.f32 %v176_v44, %v43_v36  ;;  %v126_v49 = vadd.f32 %v125_v45, %v43_v36  ;;  %v178_v50 = vpop.f32.mrb[3].mxu1 }
  0xe0   :  { %v200_v52 = vpack.c.bf16 %v124_v43, %v120_v42  ;;  %v179_v53 = vadd.f32 %v178_v50, %v43_v36  ;;  %v226_v36 = vpop.permute.xlu1 %225 }
  0xe1   :  { %v202_v54 = vpack.c.bf16 %v177_v48, %v173_v46  ;;  %v201_v55 = vpack.c.bf16 %v126_v49, %v122_v47 }
  0xe2   :  { %v203_v56 = vpack.c.bf16 %v179_v53, %v175_v51 }
  0xe3   :  { %v129_v58 = vpop.f32.mrb[4].mxu0  ;;  %245 = vmatprep.subr.bf16.mxu0 %v201_v55 }
  0xe4   :  { %v182_v59 = vpop.f32.mrb[4].mxu1  ;;  %298 = vmatprep.subr.bf16.mxu1 %v203_v56  ;;  %v131_v60 = vpop.f32.mrb[5].mxu0  ;;  %246 = vmatpush1.bf16.msra.mxu0 %v200_v52  ;;  %v130_v63 = vadd.f32 %v129_v58, %v48_v35 }
  0xe5   :  { %v184_v61 = vpop.f32.mrb[5].mxu1  ;;  %299 = vmatpush1.bf16.msra.mxu1 %v202_v54  ;;  %v133_v62 = vpop.f32.mrb[6].mxu0  ;;  %v183_v3 = vadd.f32 %v182_v59, %v48_v35  ;;  %v132_v4 = vadd.f32 %v131_v60, %v48_v35 }
  0xe6   :  { %v134_v0 = vadd.f32 %v133_v62, %v53_v57  ;;  %v186_v1 = vpop.f32.mrb[6].mxu1  ;;  %v135_v2 = vpop.f32.mrb[7].mxu0  ;;  %v185_v9 = vadd.f32 %v184_v61, %v48_v35 }
  0xe7   :  { %v187_v5 = vadd.f32 %v186_v1, %v53_v57  ;;  %v136_v6 = vadd.f32 %v135_v2, %v53_v57  ;;  %v188_v8 = vpop.f32.mrb[7].mxu1  ;;  %v221_v35 = vpop.permute.xlu0 %220 }
  0xe8   :  { %v204_v10 = vpack.c.bf16 %v134_v0, %v130_v63  ;;  %v189_v11 = vadd.f32 %v188_v8, %v53_v57 }
  0xe9   :  { %v206_v12 = vpack.c.bf16 %v187_v5, %v183_v3  ;;  %v205_v13 = vpack.c.bf16 %v136_v6, %v132_v4 }
  0xea   :  { %v207_v14 = vpack.c.bf16 %v189_v11, %v185_v9 }
  0xeb   :  { %247 = vmatprep.subr.bf16.mxu0 %v205_v13 }
  0xec   :  { %300 = vmatprep.subr.bf16.mxu1 %v207_v14  ;;  %248 = vmatpush1.bf16.msra.mxu0 %v204_v10  ;;  %v1140_v14 = vld [vmem:[%s1506_s2 + $0x10] sm:$0xff]  }
  0xed   :  { %301 = vmatpush1.bf16.msra.mxu1 %v206_v12 }
  0xef   :  { %1072 = vmatmul.mubr.msk.bf16.vlgmr.msra.gmra.mrb[8].mxu0 %vm238_vm2, %v1138_v15 }
  0xf0   :  { %1074 = vmatmul.mubr.msk.bf16.vlgmr.msra.gmra.mrb[8].mxu1 %vm238_vm2, %v1138_v15  ;;  %287 = vmatprep.mubr.bf16.mxu0 %v1300_v7  ;;  %v1141_v15 = vld [vmem:[%s1506_s2 + $0x18] sm:$0xff]  }
  0xf1   :  { %340 = vmatprep.mubr.bf16.mxu1 %v1300_v7 }
  0xf7   :  { %1073 = vmatmul.mubr.msk.bf16.gmra.mrb[12].mxu0 %vm238_vm2, %v1139_v16 }
  0xf8   :  { %1075 = vmatmul.mubr.msk.bf16.gmra.mrb[12].mxu1 %vm238_vm2, %v1139_v16  ;;  %453 = vmatprep.mubr.bf16.mxu0 %v1300_v7  ;;  %v388_v16 = vpop.permute.xlu0 %387 }
  0xf9   :  { %506 = vmatprep.mubr.bf16.mxu1 %v1300_v7 }
 0x1c2   :  { %v279_v19 = vpop.f32.mrb[8].mxu0 }
 0x1c3   :  { %v280_v20 = vadd.f32 %v279_v19, %v211_v17  ;;  %v332_v21 = vpop.f32.mrb[8].mxu1  ;;  %v281_v22 = vpop.f32.mrb[9].mxu0 }
 0x1c4   :  { %v333_v23 = vadd.f32 %v332_v21, %v211_v17  ;;  %v282_v24 = vadd.f32 %v281_v22, %v211_v17  ;;  %v334_v25 = vpop.f32.mrb[9].mxu1  ;;  %v283_v26 = vpop.f32.mrb[10].mxu0 }
 0x1c5   :  { %1148 = vtanh.f32 %v280_v20  ;;  %v335_v27 = vadd.f32 %v334_v25, %v211_v17  ;;  %v284_v28 = vadd.f32 %v283_v26, %v216_v18  ;;  %v336_v29 = vpop.f32.mrb[10].mxu1  ;;  %v285_v30 = vpop.f32.mrb[11].mxu0 }
 0x1c6   :  { %1150 = vtanh.f32 %v333_v23  ;;  %v337_v31 = vadd.f32 %v336_v29, %v216_v18  ;;  %v338_v32 = vpop.f32.mrb[11].mxu1  ;;  %v286_v33 = vadd.f32 %v285_v30, %v216_v18  ;;  %v393_v17 = vpop.permute.xlu1 %392 }
 0x1c7   :  { %1152 = vtanh.f32 %v282_v24  ;;  %v339_v34 = vadd.f32 %v338_v32, %v216_v18 }
 0x1c8   :  { %1154 = vtanh.f32 %v335_v27 }
 0x1c9   :  { %1156 = vtanh.f32 %v284_v28 }
 0x1ca   :  { %1158 = vtanh.f32 %v337_v31  ;;  %v289_v37 = vpop.f32.mrb[12].mxu0 }
 0x1cb   :  { %1160 = vtanh.f32 %v286_v33  ;;  %v290_v38 = vadd.f32 %v289_v37, %v221_v35  ;;  %v342_v39 = vpop.f32.mrb[12].mxu1  ;;  %v291_v40 = vpop.f32.mrb[13].mxu0 }
 0x1cc   :  { %1162 = vtanh.f32 %v339_v34  ;;  %v343_v41 = vadd.f32 %v342_v39, %v221_v35  ;;  %v292_v42 = vadd.f32 %v291_v40, %v221_v35  ;;  %v344_v43 = vpop.f32.mrb[13].mxu1  ;;  %v293_v44 = vpop.f32.mrb[14].mxu0 }
 0x1cd   :  { %1164 = vtanh.f32 %v290_v38  ;;  %v345_v45 = vadd.f32 %v344_v43, %v221_v35  ;;  %v294_v46 = vadd.f32 %v293_v44, %v226_v36  ;;  %v346_v47 = vpop.f32.mrb[14].mxu1  ;;  %v295_v48 = vpop.f32.mrb[15].mxu0 }
 0x1ce   :  { %1166 = vtanh.f32 %v343_v41  ;;  %v347_v49 = vadd.f32 %v346_v47, %v226_v36  ;;  %v348_v50 = vpop.f32.mrb[15].mxu1  ;;  %v296_v52 = vadd.f32 %v295_v48, %v226_v36  ;;  %v398_v34 = vpop.permute.xlu0 %397 }
 0x1cf   :  { %v1149_v51 = vpop.eup %1148  ;;  %1168 = vtanh.f32 %v292_v42  ;;  %v349_v54 = vadd.f32 %v348_v50, %v226_v36  ;;  %v403_v35 = vpop.permute.xlu1 %402 }
 0x1d0   :  { %v1151_v53 = vpop.eup %1150  ;;  %1170 = vtanh.f32 %v345_v45 }
 0x1d1   :  { %v1153_v55 = vpop.eup %1152  ;;  %1172 = vtanh.f32 %v294_v46 }
 0x1d2   :  { %v1155_v56 = vpop.eup %1154  ;;  %1174 = vtanh.f32 %v347_v49 }
 0x1d3   :  { %v1157_v57 = vpop.eup %1156  ;;  %1176 = vtanh.f32 %v296_v52 }
 0x1d4   :  { %v1159_v58 = vpop.eup %1158  ;;  %1178 = vtanh.f32 %v349_v54  ;;  %v377_v59 = vpack.c.bf16 %v1157_v57, %v1149_v51 }
 0x1d5   :  { %v1161_v60 = vpop.eup %1160  ;;  %v379_v61 = vpack.c.bf16 %v1159_v58, %v1151_v53 }
 0x1d6   :  { %v1163_v62 = vpop.eup %1162  ;;  %v378_v63 = vpack.c.bf16 %v1161_v60, %v1153_v55 }
 0x1d7   :  { %v1165_v0 = vpop.eup %1164  ;;  %v380_v1 = vpack.c.bf16 %v1163_v62, %v1155_v56 }
 0x1d8   :  { %v1167_v2 = vpop.eup %1166  ;;  %421 = vmatprep.subr.bf16.mxu0 %v378_v63 }
 0x1d9   :  { %v1169_v3 = vpop.eup %1168  ;;  %474 = vmatprep.subr.bf16.mxu1 %v380_v1  ;;  %422 = vmatpush1.bf16.msra.mxu0 %v377_v59 }
 0x1da   :  { %v1171_v4 = vpop.eup %1170  ;;  %475 = vmatpush1.bf16.msra.mxu1 %v379_v61 }
 0x1db   :  { %v1173_v5 = vpop.eup %1172 }
 0x1dc   :  { %v1175_v6 = vpop.eup %1174  ;;  %v381_v8 = vpack.c.bf16 %v1173_v5, %v1165_v0 }
 0x1dd   :  { %v1177_v9 = vpop.eup %1176  ;;  %v383_v10 = vpack.c.bf16 %v1175_v6, %v1167_v2 }
 0x1de   :  { %v1179_v11 = vpop.eup %1178  ;;  %v382_v12 = vpack.c.bf16 %v1177_v9, %v1169_v3 }
 0x1df   :  { %v384_v13 = vpack.c.bf16 %v1179_v11, %v1171_v4 }
 0x1e0   :  { %423 = vmatprep.subr.bf16.mxu0 %v382_v12 }
 0x1e1   :  { %476 = vmatprep.subr.bf16.mxu1 %v384_v13  ;;  %424 = vmatpush1.bf16.msra.mxu0 %v381_v8  ;;  %v1142_v13 = vld [vmem:[%s1506_s2 + $0x20] sm:$0xff]  }
 0x1e2   :  { %477 = vmatpush1.bf16.msra.mxu1 %v383_v10 }
 0x1e4   :  { %1086 = vmatmul.mubr.msk.bf16.vlgmr.msra.gmra.mrb[16].mxu0 %vm238_vm2, %v1140_v14 }
 0x1e5   :  { %1088 = vmatmul.mubr.msk.bf16.vlgmr.msra.gmra.mrb[16].mxu1 %vm238_vm2, %v1140_v14  ;;  %463 = vmatprep.mubr.bf16.mxu0 %v1300_v7  ;;  %v1143_v14 = vld [vmem:[%s1506_s2 + $0x28] sm:$0xff]  }
 0x1e6   :  { %516 = vmatprep.mubr.bf16.mxu1 %v1300_v7 }
 0x1ec   :  { %1087 = vmatmul.mubr.msk.bf16.gmra.mrb[20].mxu0 %vm238_vm2, %v1141_v15 }
 0x1ed   :  { %1089 = vmatmul.mubr.msk.bf16.gmra.mrb[20].mxu1 %vm238_vm2, %v1141_v15  ;;  %629 = vmatprep.mubr.bf16.mxu0 %v1300_v7  ;;  %v564_v15 = vpop.permute.xlu0 %563 }
 0x1ee   :  { %682 = vmatprep.mubr.bf16.mxu1 %v1300_v7 }
 0x2b7   :  { %v455_v18 = vpop.f32.mrb[16].mxu0 }
 0x2b8   :  { %v456_v19 = vadd.f32 %v455_v18, %v388_v16  ;;  %v508_v20 = vpop.f32.mrb[16].mxu1  ;;  %v457_v21 = vpop.f32.mrb[17].mxu0 }
 0x2b9   :  { %v509_v22 = vadd.f32 %v508_v20, %v388_v16  ;;  %v458_v23 = vadd.f32 %v457_v21, %v388_v16  ;;  %v510_v24 = vpop.f32.mrb[17].mxu1  ;;  %v459_v25 = vpop.f32.mrb[18].mxu0 }
 0x2ba   :  { %1180 = vtanh.f32 %v456_v19  ;;  %v511_v26 = vadd.f32 %v510_v24, %v388_v16  ;;  %v460_v27 = vadd.f32 %v459_v25, %v393_v17  ;;  %v512_v28 = vpop.f32.mrb[18].mxu1  ;;  %v461_v29 = vpop.f32.mrb[19].mxu0 }
 0x2bb   :  { %1182 = vtanh.f32 %v509_v22  ;;  %v513_v30 = vadd.f32 %v512_v28, %v393_v17  ;;  %v514_v31 = vpop.f32.mrb[19].mxu1  ;;  %v462_v32 = vadd.f32 %v461_v29, %v393_v17  ;;  %v569_v16 = vpop.permute.xlu1 %568 }
 0x2bc   :  { %1184 = vtanh.f32 %v458_v23  ;;  %v515_v33 = vadd.f32 %v514_v31, %v393_v17 }
 0x2bd   :  { %1186 = vtanh.f32 %v511_v26 }
 0x2be   :  { %1188 = vtanh.f32 %v460_v27 }
 0x2bf   :  { %1190 = vtanh.f32 %v513_v30  ;;  %v465_v36 = vpop.f32.mrb[20].mxu0 }
 0x2c0   :  { %1192 = vtanh.f32 %v462_v32  ;;  %v466_v37 = vadd.f32 %v465_v36, %v398_v34  ;;  %v518_v38 = vpop.f32.mrb[20].mxu1  ;;  %v467_v39 = vpop.f32.mrb[21].mxu0 }
 0x2c1   :  { %1194 = vtanh.f32 %v515_v33  ;;  %v519_v40 = vadd.f32 %v518_v38, %v398_v34  ;;  %v468_v41 = vadd.f32 %v467_v39, %v398_v34  ;;  %v520_v42 = vpop.f32.mrb[21].mxu1  ;;  %v469_v43 = vpop.f32.mrb[22].mxu0 }
 0x2c2   :  { %1196 = vtanh.f32 %v466_v37  ;;  %v521_v44 = vadd.f32 %v520_v42, %v398_v34  ;;  %v470_v45 = vadd.f32 %v469_v43, %v403_v35  ;;  %v522_v46 = vpop.f32.mrb[22].mxu1  ;;  %v471_v47 = vpop.f32.mrb[23].mxu0 }
 0x2c3   :  { %1198 = vtanh.f32 %v519_v40  ;;  %v523_v48 = vadd.f32 %v522_v46, %v403_v35  ;;  %v524_v49 = vpop.f32.mrb[23].mxu1  ;;  %v472_v51 = vadd.f32 %v471_v47, %v403_v35  ;;  %v574_v33 = vpop.permute.xlu0 %573 }
 0x2c4   :  { %v1181_v50 = vpop.eup %1180  ;;  %1200 = vtanh.f32 %v468_v41  ;;  %v525_v53 = vadd.f32 %v524_v49, %v403_v35  ;;  %v579_v34 = vpop.permute.xlu1 %578 }
 0x2c5   :  { %v1183_v52 = vpop.eup %1182  ;;  %1202 = vtanh.f32 %v521_v44 }
 0x2c6   :  { %v1185_v54 = vpop.eup %1184  ;;  %1204 = vtanh.f32 %v470_v45 }
 0x2c7   :  { %v1187_v55 = vpop.eup %1186  ;;  %1206 = vtanh.f32 %v523_v48 }
 0x2c8   :  { %v1189_v56 = vpop.eup %1188  ;;  %1208 = vtanh.f32 %v472_v51 }
 0x2c9   :  { %v1191_v57 = vpop.eup %1190  ;;  %1210 = vtanh.f32 %v525_v53  ;;  %v553_v58 = vpack.c.bf16 %v1189_v56, %v1181_v50 }
 0x2ca   :  { %v1193_v59 = vpop.eup %1192  ;;  %v555_v60 = vpack.c.bf16 %v1191_v57, %v1183_v52 }
 0x2cb   :  { %v1195_v61 = vpop.eup %1194  ;;  %v554_v62 = vpack.c.bf16 %v1193_v59, %v1185_v54 }
 0x2cc   :  { %v1197_v63 = vpop.eup %1196  ;;  %v556_v0 = vpack.c.bf16 %v1195_v61, %v1187_v55 }
 0x2cd   :  { %v1199_v1 = vpop.eup %1198  ;;  %597 = vmatprep.subr.bf16.mxu0 %v554_v62 }
 0x2ce   :  { %v1201_v2 = vpop.eup %1200  ;;  %650 = vmatprep.subr.bf16.mxu1 %v556_v0  ;;  %598 = vmatpush1.bf16.msra.mxu0 %v553_v58 }
 0x2cf   :  { %v1203_v3 = vpop.eup %1202  ;;  %651 = vmatpush1.bf16.msra.mxu1 %v555_v60 }
 0x2d0   :  { %v1205_v4 = vpop.eup %1204 }
 0x2d1   :  { %v1207_v5 = vpop.eup %1206  ;;  %v557_v6 = vpack.c.bf16 %v1205_v4, %v1197_v63 }
 0x2d2   :  { %v1209_v8 = vpop.eup %1208  ;;  %v559_v9 = vpack.c.bf16 %v1207_v5, %v1199_v1 }
 0x2d3   :  { %v1211_v10 = vpop.eup %1210  ;;  %v558_v11 = vpack.c.bf16 %v1209_v8, %v1201_v2 }
 0x2d4   :  { %v560_v12 = vpack.c.bf16 %v1211_v10, %v1203_v3 }
 0x2d5   :  { %599 = vmatprep.subr.bf16.mxu0 %v558_v11 }
 0x2d6   :  { %652 = vmatprep.subr.bf16.mxu1 %v560_v12  ;;  %600 = vmatpush1.bf16.msra.mxu0 %v557_v6  ;;  %v1144_v12 = vld [vmem:[%s1506_s2 + $0x30] sm:$0xff]  }
 0x2d7   :  { %653 = vmatpush1.bf16.msra.mxu1 %v559_v9 }
 0x2d9   :  { %1100 = vmatmul.mubr.msk.bf16.vlgmr.msra.gmra.mrb[24].mxu0 %vm238_vm2, %v1142_v13 }
 0x2da   :  { %1102 = vmatmul.mubr.msk.bf16.vlgmr.msra.gmra.mrb[24].mxu1 %vm238_vm2, %v1142_v13  ;;  %639 = vmatprep.mubr.bf16.mxu0 %v1300_v7  ;;  %v1145_v13 = vld [vmem:[%s1506_s2 + $0x38] sm:$0xff]  }
 0x2db   :  { %692 = vmatprep.mubr.bf16.mxu1 %v1300_v7 }
 0x2e1   :  { %1101 = vmatmul.mubr.msk.bf16.gmra.mrb[28].mxu0 %vm238_vm2, %v1143_v14 }
 0x2e2   :  { %1103 = vmatmul.mubr.msk.bf16.gmra.mrb[28].mxu1 %vm238_vm2, %v1143_v14  ;;  %805 = vmatprep.mubr.bf16.mxu0 %v1300_v7  ;;  %v740_v14 = vpop.permute.xlu0 %739 }
 0x2e3   :  { %858 = vmatprep.mubr.bf16.mxu1 %v1300_v7 }
 0x3ac   :  { %v631_v17 = vpop.f32.mrb[24].mxu0 }
 0x3ad   :  { %v632_v18 = vadd.f32 %v631_v17, %v564_v15  ;;  %v684_v19 = vpop.f32.mrb[24].mxu1  ;;  %v633_v20 = vpop.f32.mrb[25].mxu0 }
 0x3ae   :  { %v685_v21 = vadd.f32 %v684_v19, %v564_v15  ;;  %v634_v22 = vadd.f32 %v633_v20, %v564_v15  ;;  %v686_v23 = vpop.f32.mrb[25].mxu1  ;;  %v635_v24 = vpop.f32.mrb[26].mxu0 }
 0x3af   :  { %1212 = vtanh.f32 %v632_v18  ;;  %v687_v25 = vadd.f32 %v686_v23, %v564_v15  ;;  %v636_v26 = vadd.f32 %v635_v24, %v569_v16  ;;  %v688_v27 = vpop.f32.mrb[26].mxu1  ;;  %v637_v28 = vpop.f32.mrb[27].mxu0 }
 0x3b0   :  { %1214 = vtanh.f32 %v685_v21  ;;  %v689_v29 = vadd.f32 %v688_v27, %v569_v16  ;;  %v690_v30 = vpop.f32.mrb[27].mxu1  ;;  %v638_v31 = vadd.f32 %v637_v28, %v569_v16  ;;  %v745_v15 = vpop.permute.xlu1 %744 }
 0x3b1   :  { %1216 = vtanh.f32 %v634_v22  ;;  %v691_v32 = vadd.f32 %v690_v30, %v569_v16 }
 0x3b2   :  { %1218 = vtanh.f32 %v687_v25 }
 0x3b3   :  { %1220 = vtanh.f32 %v636_v26 }
 0x3b4   :  { %1222 = vtanh.f32 %v689_v29  ;;  %v641_v35 = vpop.f32.mrb[28].mxu0 }
 0x3b5   :  { %1224 = vtanh.f32 %v638_v31  ;;  %v642_v36 = vadd.f32 %v641_v35, %v574_v33  ;;  %v694_v37 = vpop.f32.mrb[28].mxu1  ;;  %v643_v38 = vpop.f32.mrb[29].mxu0 }
 0x3b6   :  { %1226 = vtanh.f32 %v691_v32  ;;  %v695_v39 = vadd.f32 %v694_v37, %v574_v33  ;;  %v644_v40 = vadd.f32 %v643_v38, %v574_v33  ;;  %v696_v41 = vpop.f32.mrb[29].mxu1  ;;  %v645_v42 = vpop.f32.mrb[30].mxu0 }
 0x3b7   :  { %1228 = vtanh.f32 %v642_v36  ;;  %v697_v43 = vadd.f32 %v696_v41, %v574_v33  ;;  %v646_v44 = vadd.f32 %v645_v42, %v579_v34  ;;  %v698_v45 = vpop.f32.mrb[30].mxu1  ;;  %v647_v46 = vpop.f32.mrb[31].mxu0 }
 0x3b8   :  { %1230 = vtanh.f32 %v695_v39  ;;  %v699_v47 = vadd.f32 %v698_v45, %v579_v34  ;;  %v700_v48 = vpop.f32.mrb[31].mxu1  ;;  %v648_v50 = vadd.f32 %v647_v46, %v579_v34  ;;  %v750_v32 = vpop.permute.xlu0 %749 }
 0x3b9   :  { %v1213_v49 = vpop.eup %1212  ;;  %1232 = vtanh.f32 %v644_v40  ;;  %v701_v52 = vadd.f32 %v700_v48, %v579_v34  ;;  %v755_v33 = vpop.permute.xlu1 %754 }
 0x3ba   :  { %v1215_v51 = vpop.eup %1214  ;;  %1234 = vtanh.f32 %v697_v43 }
 0x3bb   :  { %v1217_v53 = vpop.eup %1216  ;;  %1236 = vtanh.f32 %v646_v44 }
 0x3bc   :  { %v1219_v54 = vpop.eup %1218  ;;  %1238 = vtanh.f32 %v699_v47 }
 0x3bd   :  { %v1221_v55 = vpop.eup %1220  ;;  %1240 = vtanh.f32 %v648_v50 }
 0x3be   :  { %v1223_v56 = vpop.eup %1222  ;;  %1242 = vtanh.f32 %v701_v52  ;;  %v729_v57 = vpack.c.bf16 %v1221_v55, %v1213_v49 }
 0x3bf   :  { %v1225_v58 = vpop.eup %1224  ;;  %v731_v59 = vpack.c.bf16 %v1223_v56, %v1215_v51 }
 0x3c0   :  { %v1227_v60 = vpop.eup %1226  ;;  %v730_v61 = vpack.c.bf16 %v1225_v58, %v1217_v53 }
 0x3c1   :  { %v1229_v62 = vpop.eup %1228  ;;  %v732_v63 = vpack.c.bf16 %v1227_v60, %v1219_v54 }
 0x3c2   :  { %v1231_v0 = vpop.eup %1230  ;;  %773 = vmatprep.subr.bf16.mxu0 %v730_v61 }
 0x3c3   :  { %v1233_v1 = vpop.eup %1232  ;;  %826 = vmatprep.subr.bf16.mxu1 %v732_v63  ;;  %774 = vmatpush1.bf16.msra.mxu0 %v729_v57 }
 0x3c4   :  { %v1235_v2 = vpop.eup %1234  ;;  %827 = vmatpush1.bf16.msra.mxu1 %v731_v59 }
 0x3c5   :  { %v1237_v3 = vpop.eup %1236 }
 0x3c6   :  { %v1239_v4 = vpop.eup %1238  ;;  %v733_v5 = vpack.c.bf16 %v1237_v3, %v1229_v62 }
 0x3c7   :  { %v1241_v6 = vpop.eup %1240  ;;  %v735_v8 = vpack.c.bf16 %v1239_v4, %v1231_v0 }
 0x3c8   :  { %v1243_v9 = vpop.eup %1242  ;;  %v734_v10 = vpack.c.bf16 %v1241_v6, %v1233_v1 }
 0x3c9   :  { %v736_v11 = vpack.c.bf16 %v1243_v9, %v1235_v2 }
 0x3ca   :  { %775 = vmatprep.subr.bf16.mxu0 %v734_v10 }
 0x3cb   :  { %828 = vmatprep.subr.bf16.mxu1 %v736_v11  ;;  %776 = vmatpush1.bf16.msra.mxu0 %v733_v5  ;;  %v1146_v11 = vld [vmem:[%s1506_s2 + $0x40] sm:$0xff]  }
 0x3cc   :  { %829 = vmatpush1.bf16.msra.mxu1 %v735_v8 }
 0x3ce   :  { %1114 = vmatmul.mubr.msk.bf16.vlgmr.msra.gmra.mrb[32].mxu0 %vm238_vm2, %v1144_v12 }
 0x3cf   :  { %1116 = vmatmul.mubr.msk.bf16.vlgmr.msra.gmra.mrb[32].mxu1 %vm238_vm2, %v1144_v12  ;;  %815 = vmatprep.mubr.bf16.mxu0 %v1300_v7  ;;  %v1147_v12 = vld [vmem:[%s1506_s2 + $0x48] sm:$0xff]   ;;  %s1276_s2 = scalar_lea.vmem %s1051_s6, 512 }
 0x3d0   :  { %868 = vmatprep.mubr.bf16.mxu1 %v1300_v7  ;;  %p1277_p0 = scmp.ne.s32.totalorder %s1051_s6, %s1276_s2  ;;  %p1282_p2 = scmp.lt.s32.totalorder %s1276_s2, %s1276_s2 }
 0x3d2   :  { %p1283_p3 = por %p1282_p2, %p1281_p1 }
 0x3d4   :  { %p1284_p4 = pnand %p1283_p3, %p1277_p0 }
 0x3d6   :  { %1115 = vmatmul.mubr.msk.bf16.gmra.mrb[36].mxu0 %vm238_vm2, %v1145_v13 }
 0x3d7   :  { %1117 = vmatmul.mubr.msk.bf16.gmra.mrb[36].mxu1 %vm238_vm2, %v1145_v13  ;;  %978 = vmatprep.mubr.bf16.mxu0 %v1300_v7  ;;  %v916_v13 = vpop.permute.xlu0 %915 }
 0x3d8   :  { %1025 = vmatprep.mubr.bf16.mxu1 %v1300_v7 }
 0x4a1   :  { %v807_v16 = vpop.f32.mrb[32].mxu0 }
 0x4a2   :  { %v808_v17 = vadd.f32 %v807_v16, %v740_v14  ;;  %v860_v18 = vpop.f32.mrb[32].mxu1  ;;  %v809_v19 = vpop.f32.mrb[33].mxu0 }
 0x4a3   :  { %v861_v20 = vadd.f32 %v860_v18, %v740_v14  ;;  %v810_v21 = vadd.f32 %v809_v19, %v740_v14  ;;  %v862_v22 = vpop.f32.mrb[33].mxu1  ;;  %v811_v23 = vpop.f32.mrb[34].mxu0 }
 0x4a4   :  { %1244 = vtanh.f32 %v808_v17  ;;  %v863_v24 = vadd.f32 %v862_v22, %v740_v14  ;;  %v812_v25 = vadd.f32 %v811_v23, %v745_v15  ;;  %v864_v26 = vpop.f32.mrb[34].mxu1  ;;  %v813_v27 = vpop.f32.mrb[35].mxu0 }
 0x4a5   :  { %1246 = vtanh.f32 %v861_v20  ;;  %v865_v28 = vadd.f32 %v864_v26, %v745_v15  ;;  %v866_v29 = vpop.f32.mrb[35].mxu1  ;;  %v814_v30 = vadd.f32 %v813_v27, %v745_v15 }
 0x4a6   :  { %1248 = vtanh.f32 %v810_v21  ;;  %v867_v31 = vadd.f32 %v866_v29, %v745_v15 }
 0x4a7   :  { %1250 = vtanh.f32 %v863_v24 }
 0x4a8   :  { %1252 = vtanh.f32 %v812_v25 }
 0x4a9   :  { %1254 = vtanh.f32 %v865_v28  ;;  %v817_v34 = vpop.f32.mrb[36].mxu0 }
 0x4aa   :  { %1256 = vtanh.f32 %v814_v30  ;;  %v818_v35 = vadd.f32 %v817_v34, %v750_v32  ;;  %v870_v36 = vpop.f32.mrb[36].mxu1  ;;  %v819_v37 = vpop.f32.mrb[37].mxu0 }
 0x4ab   :  { %1258 = vtanh.f32 %v867_v31  ;;  %v871_v38 = vadd.f32 %v870_v36, %v750_v32  ;;  %v820_v39 = vadd.f32 %v819_v37, %v750_v32  ;;  %v872_v40 = vpop.f32.mrb[37].mxu1  ;;  %v821_v41 = vpop.f32.mrb[38].mxu0 }
 0x4ac   :  { %1260 = vtanh.f32 %v818_v35  ;;  %v873_v42 = vadd.f32 %v872_v40, %v750_v32  ;;  %v822_v43 = vadd.f32 %v821_v41, %v755_v33  ;;  %v874_v44 = vpop.f32.mrb[38].mxu1  ;;  %v823_v45 = vpop.f32.mrb[39].mxu0 }
 0x4ad   :  { %1262 = vtanh.f32 %v871_v38  ;;  %v875_v46 = vadd.f32 %v874_v44, %v755_v33  ;;  %v876_v47 = vpop.f32.mrb[39].mxu1  ;;  %v824_v49 = vadd.f32 %v823_v45, %v755_v33 }
 0x4ae   :  { %v1245_v48 = vpop.eup %1244  ;;  %1264 = vtanh.f32 %v820_v39  ;;  %v877_v51 = vadd.f32 %v876_v47, %v755_v33 }
 0x4af   :  { %v1247_v50 = vpop.eup %1246  ;;  %1266 = vtanh.f32 %v873_v42 }
 0x4b0   :  { %v1249_v52 = vpop.eup %1248  ;;  %1268 = vtanh.f32 %v822_v43 }
 0x4b1   :  { %v1251_v53 = vpop.eup %1250  ;;  %1270 = vtanh.f32 %v875_v46 }
 0x4b2   :  { %v1253_v54 = vpop.eup %1252  ;;  %1272 = vtanh.f32 %v824_v49 }
 0x4b3   :  { %v1255_v55 = vpop.eup %1254  ;;  %1274 = vtanh.f32 %v877_v51  ;;  %v905_v56 = vpack.c.bf16 %v1253_v54, %v1245_v48 }
 0x4b4   :  { %v1257_v57 = vpop.eup %1256  ;;  %v907_v58 = vpack.c.bf16 %v1255_v55, %v1247_v50 }
 0x4b5   :  { %v1259_v59 = vpop.eup %1258  ;;  %v906_v60 = vpack.c.bf16 %v1257_v57, %v1249_v52 }
 0x4b6   :  { %v1261_v61 = vpop.eup %1260  ;;  %v908_v62 = vpack.c.bf16 %v1259_v59, %v1251_v53 }
 0x4b7   :  { %v1263_v63 = vpop.eup %1262  ;;  %946 = vmatprep.subr.bf16.mxu0 %v906_v60 }
 0x4b8   :  { %v1265_v0 = vpop.eup %1264  ;;  %993 = vmatprep.subr.bf16.mxu1 %v908_v62  ;;  %947 = vmatpush1.bf16.msra.mxu0 %v905_v56 }
 0x4b9   :  { %v1267_v1 = vpop.eup %1266  ;;  %994 = vmatpush1.bf16.msra.mxu1 %v907_v58 }
 0x4ba   :  { %v1269_v2 = vpop.eup %1268 }
 0x4bb   :  { %v1271_v3 = vpop.eup %1270  ;;  %v909_v4 = vpack.c.bf16 %v1269_v2, %v1261_v61 }
 0x4bc   :  { %v1273_v5 = vpop.eup %1272  ;;  %v911_v6 = vpack.c.bf16 %v1271_v3, %v1263_v63 }
 0x4bd   :  { %v1275_v8 = vpop.eup %1274  ;;  %v910_v9 = vpack.c.bf16 %v1273_v5, %v1265_v0 }
 0x4be   :  { %v912_v10 = vpack.c.bf16 %v1275_v8, %v1267_v1 }
 0x4bf   :  { %948 = vmatprep.subr.bf16.mxu0 %v910_v9 }
 0x4c0   :  { %995 = vmatprep.subr.bf16.mxu1 %v912_v10  ;;  %949 = vmatpush1.bf16.msra.mxu0 %v909_v4 }
 0x4c1   :  { %996 = vmatpush1.bf16.msra.mxu1 %v911_v6 }
 0x4c3   :  { %1128 = vmatmul.mubr.msk.bf16.vlgmr.msra.gmra.mrb[40].mxu0 %vm238_vm2, %v1146_v11 }
 0x4c4   :  { %1130 = vmatmul.mubr.msk.bf16.vlgmr.msra.gmra.mrb[40].mxu1 %vm238_vm2, %v1146_v11  ;;  %986 = vmatprep.mubr.bf16.mxu0 %v1300_v7 }
 0x4c5   :  { %1033 = vmatprep.mubr.bf16.mxu1 %v1300_v7 }
 0x4cb   :  { %1129 = vmatmul.mubr.msk.bf16.gmra.mrb[44].mxu0 %vm238_vm2, %v1147_v12 }
 0x4cc   :  { %1131 = vmatmul.mubr.msk.bf16.gmra.mrb[44].mxu1 %vm238_vm2, %v1147_v12 }
 0x596   :  { %v980_v14 = vpop.f32.mrb[40].mxu0 }
 0x597   :  { %v981_v15 = vadd.f32 %v980_v14, %v916_v13  ;;  %v1027_v16 = vpop.f32.mrb[40].mxu1  ;;  %v982_v17 = vpop.f32.mrb[41].mxu0 }
 0x598   :  { %v1028_v18 = vadd.f32 %v1027_v16, %v916_v13  ;;  %v983_v19 = vadd.f32 %v982_v17, %v916_v13  ;;  %v1029_v20 = vpop.f32.mrb[41].mxu1  ;;  %v984_v21 = vpop.f32.mrb[42].mxu0 }
 0x599   :  { %1040 = vst [vmem:[#allocation2] sm:$0xff] %v981_v15  ;;  %v1030_v7 = vadd.f32 %v1029_v20, %v916_v13  ;;  %v1031_v22 = vpop.f32.mrb[42].mxu1  ;;  %v985_v23 = vpop.f32.mrb[43].mxu0 }
 0x59a   :  { %1042 = vst [vmem:[#allocation2 + $0x10] sm:$0xff] %v1028_v18  ;;  %1041 = vst [vmem:[#allocation2 + $0x8] sm:$0xff] %v983_v19  ;;  %v1032_v24 = vpop.f32.mrb[43].mxu1 }
 0x59b   :  { %1043 = vst [vmem:[#allocation2 + $0x18] sm:$0xff] %v1030_v7 }
 0x59c   :  { %1287 = shalt.err (!%p1284_p4)
}
 0x59d   :  { %s1288_s9 = scalar_lea.hbm %s1508_s4, 512 }
 0x59e   :  { %p1289_p5 = scmp.ne.s32.totalorder %s1508_s4, %s1288_s9  ;;  %p1292_p6 = scmp.lt.u32.totalorder %s1288_s9, %s1508_s4 }
 0x5a0   :  { %p1294_p7 = pnand %p1292_p6, %p1289_p5 }
 0x5a2   :  { %1297 = shalt.err (!%p1294_p7)
}
 0x5a3   :  { %1053 = dma.vmem_to_hbm [thread:$0]  %s1051_s6, 512, %s1508_s4, [#allocation3]   ;;  %v988_v25 = vpop.f32.mrb[44].mxu0  ;;  %v1035_v26 = vpop.f32.mrb[44].mxu1 }
 0x5a4   :  { %v989_v27 = vpop.f32.mrb[45].mxu0  ;;  %v1036_v28 = vpop.f32.mrb[45].mxu1 }
 0x5a5   :  { %v990_v29 = vpop.f32.mrb[46].mxu0  ;;  %v1037_v30 = vpop.f32.mrb[46].mxu1 }
 0x5a6   :  { %v991_v31 = vpop.f32.mrb[47].mxu0  ;;  %v1038_v32 = vpop.f32.mrb[47].mxu1 }
 0x5a7   :  { %1298 = dma.done.wait [#allocation3], 512  }
 0x5a8   :  { %1299 = vsyncadd [#allocation3], 4294966784 }
 0x5a9   :  { %1057 = vsyncpa [#allocation3], 1 }

</bundles_post_ra>
